<compile_context>
chip_gen: v7x
topology: tpu7x:2x2x1
jax: 0.10.0
libtpu: 0.0.40
codegen_flags: <defaults>
</compile_context>

<pallas_src>
import functools

import jax
import jax.numpy as jnp
from jax import lax
from jax.experimental import pallas as pl
from jax.experimental.pallas import tpu as pltpu

_LANE = 128
_SUBLANE = 8


def _round_up(x, m):
    return ((x + m - 1) // m) * m


# ---------------------------------------------------------------------------
# TPU generation detection (VMEM capacity, #TensorCores, bf16 VPU/EUP support)
# ---------------------------------------------------------------------------
def _tpu_generation():
    kind = ""
    try:
        kind = (jax.devices()[0].device_kind or "").lower()
    except Exception:
        pass
    is_v7 = ("v7" in kind) or ("7x" in kind)
    is_v6 = "v6" in kind
    is_v5 = "v5" in kind
    vmem_cap = None
    try:
        vmem_cap = int(pltpu.get_tpu_info().vmem_capacity_bytes)
    except Exception:
        vmem_cap = None
    if vmem_cap is None:
        # v7x: 64 MiB per TC; v5e/v5p/v6e: 128 MiB; unknown -> conservative 64 MiB.
        vmem_cap = (64 << 20) if is_v7 else ((128 << 20) if (is_v5 or is_v6) else (64 << 20))
    return {
        "kind": kind,
        "vmem_cap": vmem_cap,
        "bf16_vector": is_v6 or is_v7,   # v5e / older have no bf16 VPU/EUP
        "num_tc": 2 if is_v7 else 1,
    }


def select_rbf_dtype(matmul_dtype=jnp.bfloat16):
    """bf16 RBF only where the VPU/EUP are bf16-native and the MXU operands are bf16."""
    info = _tpu_generation()
    if info["bf16_vector"] and jnp.dtype(matmul_dtype) == jnp.bfloat16:
        return jnp.bfloat16
    return jnp.float32


# ---------------------------------------------------------------------------
# Fused Pallas kernel: the whole FasterKAN layer stack for one batch tile.
# ---------------------------------------------------------------------------
def _fasterkan_stack_kernel(x_ref, *refs, num_layers):
    """refs = [gamma_0, beta_0, c_0, w_0, ..., gamma_{L-1}, beta_{L-1}, c_{L-1}, w_{L-1}, o_ref]

    Host-side pre-folding (see pack_fasterkan_params):
      gamma_s = gamma * inv_den, beta_s = beta * inv_den,
      c[0, g*D_in + d] = grid[g] * inv_den      (stored in the RBF compute dtype)
      w2[g*D_in + d, o] = W[o, d*G + g]         (cast to the MXU dtype)
    so per layer:  xs  = LN(h)*gamma_s + beta_s
                   rbf[b, g*D+d] = 1 - tanh(xs[b,d] - c[g*D+d])^2
                   h   = rbf @ w2               (one matmul, K = G*D_in)
    """
    o_ref = refs[-1]
    h = x_ref[...]
    if h.dtype != jnp.float32:
        h = h.astype(jnp.float32)

    for l in range(num_layers):
        gamma_ref, beta_ref, c_ref, w_ref = refs[4 * l:4 * l + 4]

        # LayerNorm in f32 (biased variance, eps=1e-5); inv_denominator already
        # folded into the affine params / grid on the host.
        mu = jnp.mean(h, axis=-1, keepdims=True)
        var = jnp.mean((h - mu) ** 2, axis=-1, keepdims=True)
        xs = (h - mu) * lax.rsqrt(var + 1e-5) * gamma_ref[...] + beta_ref[...]

        # RBF in c_ref.dtype: bf16 on v6e/v7x (native bf16 EUP/VPU, half the slab
        # vregs, result feeds the bf16 dot with no extra cast pass), f32 on v5e.
        xs = xs.astype(c_ref.dtype)
        g = c_ref.shape[1] // xs.shape[1]

        # Lane-pack xs into the (TB, G*D_in) slab once, then ONE dense tanh pass.
        # (A per-grid-slice VMEM scratch slab was evaluated: for D_in % 128 != 0 it
        # trades this aligned-ish concat for unaligned slice stores and does not
        # make the EUP pass -- the bottleneck -- any denser, so the fused slab wins.)
        # TODO(synk): if pl.lower_as_mlir shows the concat materializing an extra
        # full (TB, K) relayout, switch to a VMEM scratch slab build.
        xrep = jnp.concatenate([xs] * g, axis=-1)            # (TB, G*D_in)
        t = jnp.tanh(xrep - c_ref[...])                      # dense EUP pass
        rbf = 1.0 - t * t                                    # dense VPU pass

        # Single MXU contraction per layer, K = G*D_in, f32 accumulation.
        # rbf.astype is a no-op when the RBF dtype already matches the weights.
        h = jnp.dot(rbf.astype(w_ref.dtype), w_ref[...],
                    preferred_element_type=jnp.float32)

    o_ref[...] = h.astype(o_ref.dtype)


# ---------------------------------------------------------------------------
# Host-side parameter init (mirrors the PyTorch module) and kernel packing
# ---------------------------------------------------------------------------
def init_fasterkan_params(key, layers_hidden, grid_min=-1.0, grid_max=1.0,
                          num_grids=5, inv_denominator=0.5,
                          spline_weight_init_scale=1.0):
    params = []
    grid = jnp.linspace(grid_min, grid_max, num_grids).astype(jnp.float32)
    for d_in, d_out in zip(layers_hidden[:-1], layers_hidden[1:]):
        key, sub = jax.random.split(key)
        # SplineLinear weight: trunc_normal(mean=0, std=scale), shape (d_out, d_in*G)
        w = spline_weight_init_scale * jax.random.truncated_normal(
            sub, -2.0, 2.0, (d_out, d_in * num_grids), dtype=jnp.float32)
        params.append({
            "gamma": jnp.ones((d_in,), jnp.float32),
            "beta": jnp.zeros((d_in,), jnp.float32),
            "grid": grid,
            "inv_den": jnp.float32(inv_denominator),
            "w": w,                       # (d_out, d_in * num_grids), index d*G + g
        })
    return params


def pack_fasterkan_params(params, matmul_dtype=jnp.bfloat16, rbf_dtype=None):
    """Fold inv_denominator, re-layout W to (G*D_in, D_out), pad final D_out.

    NOTE: hidden widths that are multiples of 128 give fully lane-dense
    intermediates and unmasked stores throughout; smaller widths are correct but
    leave the intermediate h in partially-masked vregs.  We deliberately do NOT
    zero-pad intermediate widths: padding K = G*D_in would add real MXU/EUP work.
    """
    if rbf_dtype is None:
        rbf_dtype = select_rbf_dtype(matmul_dtype)
    packed = []
    n = len(params)
    for idx, p in enumerate(params):
        d_out, k = p["w"].shape
        d_in = p["gamma"].shape[0]
        g = k // d_in
        inv_den = p["inv_den"]
        gamma_s = (p["gamma"] * inv_den).reshape(1, d_in).astype(jnp.float32)
        beta_s = (p["beta"] * inv_den).reshape(1, d_in).astype(jnp.float32)
        # c depends only on g within a slice; stored in the RBF compute dtype so the
        # in-kernel subtract/tanh stay in that dtype.
        c = jnp.repeat(p["grid"] * inv_den, d_in).reshape(1, g * d_in).astype(rbf_dtype)
        # W[o, d*G + g] -> w2[g*D_in + d, o]
        w2 = jnp.transpose(p["w"].reshape(d_out, d_in, g), (2, 1, 0)).reshape(g * d_in, d_out)
        if idx == n - 1:
            # Lane-dense final output: pad D_out to a multiple of 128 with zero
            # columns (unmasked stores); sliced off on the host.
            d_out_pad = _round_up(d_out, _LANE)
            w2 = jnp.pad(w2, ((0, 0), (0, d_out_pad - d_out)))
        packed.append({"gamma": gamma_s, "beta": beta_s, "c": c,
                       "w": w2.astype(matmul_dtype), "d_out": d_out})
    return packed


# ---------------------------------------------------------------------------
# pallas_call wrapper
# ---------------------------------------------------------------------------
def _fasterkan_pallas(packed, x, *, batch_tile, single_buffer_weights, interpret):
    B, d_in0 = x.shape
    num_layers = len(packed)
    d_out_last = packed[-1]["d_out"]
    d_out_pad = packed[-1]["w"].shape[1]
    info = _tpu_generation()

    # ---- generation-aware VMEM budget / batch-tile selection ----
    # Pallas double-buffers inputs by default; if single-buffering of the
    # grid-invariant weights is in effect, count them once, otherwise twice.
    buf_factor = 1 if single_buffer_weights else 2
    resident = buf_factor * sum(
        int(a.size) * a.dtype.itemsize
        for p in packed for a in (p["gamma"], p["beta"], p["c"], p["w"]))
    max_k = max(p["c"].shape[1] for p in packed)
    rbf_item = packed[0]["c"].dtype.itemsize
    widest = max([d_in0] + [p["w"].shape[1] for p in packed])
    # Bytes per batch row: double-buffered in/out tiles + in-flight slab temporaries
    # (xrep, t/rbf in the RBF dtype) + f32 LN / h temporaries, with slack.
    per_row = (2 * d_in0 * 4 + 2 * d_out_pad * 4
               + 3 * max_k * rbf_item + 4 * 4 * widest)
    budget = (info["vmem_cap"] * 3) // 4          # ~48 MiB on v7x, ~96 MiB on v5e/v6e

    if batch_tile is None:
        tb = 1024
        while tb > _SUBLANE and resident + tb * per_row > budget:
            tb //= 2
        batch_tile = tb
    batch_tile = max(_SUBLANE, min(int(batch_tile), _round_up(B, _SUBLANE)))
    batch_tile = _round_up(batch_tile, _SUBLANE)
    # v7x has 2 TensorCores: make sure the "parallel" grid has >= 2 steps to shard.
    if info["num_tc"] > 1 and B >= 2 * _SUBLANE:
        batch_tile = min(batch_tile, _round_up((B + 1) // 2, _SUBLANE))
    assert resident + batch_tile * per_row <= budget, (
        "layer weights too large to stay VMEM-resident")
    # TODO(synk): for very wide layers (weights > VMEM budget) add a D_out grid axis
    # with a blocked weight spec + VMEM scratch accumulator instead of asserting.

    # Pad batch so every grid step is a full tile (no partial blocks).
    b_pad = _round_up(B, batch_tile)
    if b_pad != B:
        x = jnp.pad(x, ((0, b_pad - B), (0, 0)))
    num_tiles = b_pad // batch_tile

    kernel = functools.partial(_fasterkan_stack_kernel, num_layers=num_layers)

    in_specs = [pl.BlockSpec((batch_tile, d_in0), lambda i: (i, 0))]
    operands = [x]
    for p in packed:
        for name in ("gamma", "beta", "c", "w"):
            a = p[name]
            if single_buffer_weights:
                # Constant index_map -> fetched once; Buffered(1) avoids allocating a
                # useless second buffer for these grid-invariant operands.
                spec = pl.BlockSpec(a.shape, lambda i: (0, 0),
                                    pipeline_mode=pl.Buffered(1))
            else:
                spec = pl.BlockSpec(a.shape, lambda i: (0, 0))
            in_specs.append(spec)
            operands.append(a)

    need = resident + batch_tile * per_row
    # Always leave >= 8 MiB of physical VMEM as headroom for Mosaic-internal scratch.
    vmem_limit = int(min(info["vmem_cap"] - (8 << 20),
                         max(32 << 20, need + (8 << 20))))

    out = pl.pallas_call(
        kernel,
        grid=(num_tiles,),
        in_specs=in_specs,
        out_specs=pl.BlockSpec((batch_tile, d_out_pad), lambda i: (i, 0)),
        out_shape=jax.ShapeDtypeStruct((b_pad, d_out_pad), jnp.float32),
        compiler_params=pltpu.CompilerParams(
            dimension_semantics=("parallel",),
            vmem_limit_bytes=vmem_limit),
        interpret=interpret,
    )(*operands)
    return out[:B, :d_out_last]


def fasterkan_stack(packed, x, *, batch_tile=None, interpret=False):
    try:
        out = _fasterkan_pallas(packed, x, batch_tile=batch_tile,
                                single_buffer_weights=True, interpret=interpret)
        return jax.block_until_ready(out)
    except Exception:
        # pl.Buffered(1) single-buffering of the grid-invariant weights is a pure
        # VMEM optimization; if this JAX/Mosaic build rejects it, fall back to the
        # default double-buffered pipeline (the VMEM accounting covers that case).
        out = _fasterkan_pallas(packed, x, batch_tile=batch_tile,
                                single_buffer_weights=False, interpret=interpret)
        return jax.block_until_ready(out)


def fasterkan_forward(params, x, *, matmul_dtype=jnp.bfloat16, batch_tile=None):
    packed = pack_fasterkan_params(params, matmul_dtype=matmul_dtype)
    return fasterkan_stack(packed, x, batch_tile=batch_tile)


# ---------------------------------------------------------------------------
# Pure-JAX reference (mirrors the PyTorch math; the RBF/matmul dtypes are
# selectable so the mixed-precision fast path can be validated against
# identical numerics).
# ---------------------------------------------------------------------------
def fasterkan_forward_ref(params, x, matmul_dtype=jnp.float32, rbf_dtype=jnp.float32):
    for p in params:
        mu = jnp.mean(x, axis=-1, keepdims=True)
        var = jnp.mean((x - mu) ** 2, axis=-1, keepdims=True)
        xn = (x - mu) * lax.rsqrt(var + 1e-5) * p["gamma"] + p["beta"]
        if jnp.dtype(rbf_dtype) == jnp.float32:
            diff = (xn[..., None] - p["grid"]) * p["inv_den"]          # (B, D_in, G)
            rbf = 1.0 - jnp.tanh(diff) ** 2
        else:
            # mirror the kernel's mixed-precision RBF (fold inv_den, then cast)
            xs = (xn * p["inv_den"]).astype(rbf_dtype)
            c = (p["grid"] * p["inv_den"]).astype(rbf_dtype)
            rbf = 1.0 - jnp.tanh(xs[..., None] - c) ** 2
        rbf_flat = rbf.reshape(x.shape[0], -1)                          # index d*G + g
        x = jnp.dot(rbf_flat.astype(matmul_dtype), p["w"].T.astype(matmul_dtype),
                    preferred_element_type=jnp.float32)
    return x


if __name__ == "__main__":
    key = jax.random.PRNGKey(0)
    layers_hidden = [32, 64, 16]
    batch = 8

    pkey, xkey = jax.random.split(key)
    params = init_fasterkan_params(pkey, layers_hidden)
    x = jax.random.normal(xkey, (batch, layers_hidden[0]), dtype=jnp.float32)

    # 1) f32 MXU / f32 RBF path vs full-f32 reference (tight structural check).
    out_f32 = fasterkan_forward(params, x, matmul_dtype=jnp.float32)
    ref_f32 = fasterkan_forward_ref(params, x, matmul_dtype=jnp.float32,
                                    rbf_dtype=jnp.float32)
    assert out_f32.shape == (batch, layers_hidden[-1])
    assert jnp.allclose(out_f32, ref_f32, rtol=2e-2, atol=2e-2), "f32 mismatch vs reference"

    # 2) default fast path: bf16 MXU operands + bf16 RBF on v6e/v7x (f32 RBF on v5e),
    #    validated against a reference with matching mixed precision.  Tolerance is
    #    looser because the in-kernel bf16 EUP tanh differs from XLA's tanh by a few
    #    bf16 ulps per element, accumulated over K = G*D_in contraction terms.
    rbf_dt = select_rbf_dtype(jnp.bfloat16)
    out_fast = fasterkan_forward(params, x, matmul_dtype=jnp.bfloat16)
    ref_fast = fasterkan_forward_ref(params, x, matmul_dtype=jnp.bfloat16,
                                     rbf_dtype=rbf_dt)
    assert out_fast.shape == (batch, layers_hidden[-1])
    assert jnp.allclose(out_fast, ref_fast, rtol=5e-2, atol=1e-1), "fast-path mismatch vs reference"

    print("KERNEL_OK")
</pallas_src>

<mosaic_0001>
module attributes {stable_mosaic.version = 11 : i64} {
  func.func @_fasterkan_stack_kernel(%arg0: i32, %arg1: memref<8x32xf32, #tpu.memory_space<vmem>>, %arg2: memref<1x32xf32, #tpu.memory_space<vmem>>, %arg3: memref<1x32xf32, #tpu.memory_space<vmem>>, %arg4: memref<1x160xf32, #tpu.memory_space<vmem>>, %arg5: memref<160x64xf32, #tpu.memory_space<vmem>>, %arg6: memref<1x64xf32, #tpu.memory_space<vmem>>, %arg7: memref<1x64xf32, #tpu.memory_space<vmem>>, %arg8: memref<1x320xf32, #tpu.memory_space<vmem>>, %arg9: memref<320x128xf32, #tpu.memory_space<vmem>>, %arg10: memref<8x128xf32, #tpu.memory_space<vmem>>) attributes {dimension_semantics = [#tpu.dimension_semantics<parallel>], iteration_bounds = array<i64: 1>, scalar_prefetch = 0 : i64, scratch_operands = 0 : i64, tpu.core_type = #tpu.core_type<tc>, window_params = [{transform_indices = @transform_0, window_bounds = array<i64: 8, 32>}, {pipeline_mode = #tpu.pipeline_mode<synchronous>, transform_indices = @transform_1, window_bounds = array<i64: 1, 32>}, {pipeline_mode = #tpu.pipeline_mode<synchronous>, transform_indices = @transform_2, window_bounds = array<i64: 1, 32>}, {pipeline_mode = #tpu.pipeline_mode<synchronous>, transform_indices = @transform_3, window_bounds = array<i64: 1, 160>}, {pipeline_mode = #tpu.pipeline_mode<synchronous>, transform_indices = @transform_4, window_bounds = array<i64: 160, 64>}, {pipeline_mode = #tpu.pipeline_mode<synchronous>, transform_indices = @transform_5, window_bounds = array<i64: 1, 64>}, {pipeline_mode = #tpu.pipeline_mode<synchronous>, transform_indices = @transform_6, window_bounds = array<i64: 1, 64>}, {pipeline_mode = #tpu.pipeline_mode<synchronous>, transform_indices = @transform_7, window_bounds = array<i64: 1, 320>}, {pipeline_mode = #tpu.pipeline_mode<synchronous>, transform_indices = @transform_8, window_bounds = array<i64: 320, 128>}, {transform_indices = @transform_9, window_bounds = array<i64: 8, 128>}]} {
    %c0 = arith.constant 0 : index
    %c0_0 = arith.constant 0 : index
    %0 = vector.load %arg1[%c0, %c0_0] : memref<8x32xf32, #tpu.memory_space<vmem>>, vector<8x32xf32>
    %cst = arith.constant dense<0.000000e+00> : vector<8xf32>
    %1 = vector.multi_reduction <add>, %0, %cst [1] : vector<8x32xf32> to vector<8xf32>
    %2 = vector.shape_cast %1 : vector<8xf32> to vector<8x1xf32>
    %cst_1 = arith.constant 3.200000e+01 : f32
    %3 = vector.broadcast %cst_1 : f32 to vector<8x1xf32>
    %4 = arith.divf %2, %3 : vector<8x1xf32>
    %5 = vector.broadcast %4 : vector<8x1xf32> to vector<8x32xf32>
    %6 = arith.subf %0, %5 : vector<8x32xf32>
    %7 = arith.mulf %6, %6 : vector<8x32xf32>
    %cst_2 = arith.constant dense<0.000000e+00> : vector<8xf32>
    %8 = vector.multi_reduction <add>, %7, %cst_2 [1] : vector<8x32xf32> to vector<8xf32>
    %9 = vector.shape_cast %8 : vector<8xf32> to vector<8x1xf32>
    %cst_3 = arith.constant 3.200000e+01 : f32
    %10 = vector.broadcast %cst_3 : f32 to vector<8x1xf32>
    %11 = arith.divf %9, %10 : vector<8x1xf32>
    %12 = vector.broadcast %4 : vector<8x1xf32> to vector<8x32xf32>
    %13 = arith.subf %0, %12 : vector<8x32xf32>
    %cst_4 = arith.constant 9.99999974E-6 : f32
    %14 = vector.broadcast %cst_4 : f32 to vector<8x1xf32>
    %15 = arith.addf %11, %14 : vector<8x1xf32>
    %16 = math.rsqrt %15 : vector<8x1xf32>
    %17 = vector.broadcast %16 : vector<8x1xf32> to vector<8x32xf32>
    %18 = arith.mulf %13, %17 : vector<8x32xf32>
    %c0_5 = arith.constant 0 : index
    %c0_6 = arith.constant 0 : index
    %19 = vector.load %arg2[%c0_5, %c0_6] : memref<1x32xf32, #tpu.memory_space<vmem>>, vector<1x32xf32>
    %20 = vector.broadcast %19 : vector<1x32xf32> to vector<8x32xf32>
    %21 = arith.mulf %18, %20 : vector<8x32xf32>
    %c0_7 = arith.constant 0 : index
    %c0_8 = arith.constant 0 : index
    %22 = vector.load %arg3[%c0_7, %c0_8] : memref<1x32xf32, #tpu.memory_space<vmem>>, vector<1x32xf32>
    %23 = vector.broadcast %22 : vector<1x32xf32> to vector<8x32xf32>
    %24 = arith.addf %21, %23 : vector<8x32xf32>
    %25 = tpu.concatenate %24, %24, %24, %24, %24 in 1 : vector<8x32xf32>, vector<8x32xf32>, vector<8x32xf32>, vector<8x32xf32>, vector<8x32xf32> -> vector<8x160xf32>
    %c0_9 = arith.constant 0 : index
    %c0_10 = arith.constant 0 : index
    %26 = vector.load %arg4[%c0_9, %c0_10] : memref<1x160xf32, #tpu.memory_space<vmem>>, vector<1x160xf32>
    %27 = vector.broadcast %26 : vector<1x160xf32> to vector<8x160xf32>
    %28 = arith.subf %25, %27 : vector<8x160xf32>
    %29 = math.tanh %28 : vector<8x160xf32>
    %30 = arith.mulf %29, %29 : vector<8x160xf32>
    %cst_11 = arith.constant 1.000000e+00 : f32
    %31 = vector.broadcast %cst_11 : f32 to vector<8x160xf32>
    %32 = arith.subf %31, %30 : vector<8x160xf32>
    %c0_12 = arith.constant 0 : index
    %c0_13 = arith.constant 0 : index
    %33 = vector.load %arg5[%c0_12, %c0_13] : memref<160x64xf32, #tpu.memory_space<vmem>>, vector<160x64xf32>
    %cst_14 = arith.constant dense<0.000000e+00> : vector<8x64xf32>
    %34 = tpu.matmul %32, %33, %cst_14 {dimension_numbers = #tpu.dot_dimension_numbers<[1], [0], [0], [1], [0, 0, 1, 1], [], []>} : vector<8x160xf32>, vector<160x64xf32>, vector<8x64xf32> -> vector<8x64xf32>
    %cst_15 = arith.constant dense<0.000000e+00> : vector<8xf32>
    %35 = vector.multi_reduction <add>, %34, %cst_15 [1] : vector<8x64xf32> to vector<8xf32>
    %36 = vector.shape_cast %35 : vector<8xf32> to vector<8x1xf32>
    %cst_16 = arith.constant 6.400000e+01 : f32
    %37 = vector.broadcast %cst_16 : f32 to vector<8x1xf32>
    %38 = arith.divf %36, %37 : vector<8x1xf32>
    %39 = vector.broadcast %38 : vector<8x1xf32> to vector<8x64xf32>
    %40 = arith.subf %34, %39 : vector<8x64xf32>
    %41 = arith.mulf %40, %40 : vector<8x64xf32>
    %cst_17 = arith.constant dense<0.000000e+00> : vector<8xf32>
    %42 = vector.multi_reduction <add>, %41, %cst_17 [1] : vector<8x64xf32> to vector<8xf32>
    %43 = vector.shape_cast %42 : vector<8xf32> to vector<8x1xf32>
    %cst_18 = arith.constant 6.400000e+01 : f32
    %44 = vector.broadcast %cst_18 : f32 to vector<8x1xf32>
    %45 = arith.divf %43, %44 : vector<8x1xf32>
    %46 = vector.broadcast %38 : vector<8x1xf32> to vector<8x64xf32>
    %47 = arith.subf %34, %46 : vector<8x64xf32>
    %cst_19 = arith.constant 9.99999974E-6 : f32
    %48 = vector.broadcast %cst_19 : f32 to vector<8x1xf32>
    %49 = arith.addf %45, %48 : vector<8x1xf32>
    %50 = math.rsqrt %49 : vector<8x1xf32>
    %51 = vector.broadcast %50 : vector<8x1xf32> to vector<8x64xf32>
    %52 = arith.mulf %47, %51 : vector<8x64xf32>
    %c0_20 = arith.constant 0 : index
    %c0_21 = arith.constant 0 : index
    %53 = vector.load %arg6[%c0_20, %c0_21] : memref<1x64xf32, #tpu.memory_space<vmem>>, vector<1x64xf32>
    %54 = vector.broadcast %53 : vector<1x64xf32> to vector<8x64xf32>
    %55 = arith.mulf %52, %54 : vector<8x64xf32>
    %c0_22 = arith.constant 0 : index
    %c0_23 = arith.constant 0 : index
    %56 = vector.load %arg7[%c0_22, %c0_23] : memref<1x64xf32, #tpu.memory_space<vmem>>, vector<1x64xf32>
    %57 = vector.broadcast %56 : vector<1x64xf32> to vector<8x64xf32>
    %58 = arith.addf %55, %57 : vector<8x64xf32>
    %59 = tpu.concatenate %58, %58, %58, %58, %58 in 1 : vector<8x64xf32>, vector<8x64xf32>, vector<8x64xf32>, vector<8x64xf32>, vector<8x64xf32> -> vector<8x320xf32>
    %c0_24 = arith.constant 0 : index
    %c0_25 = arith.constant 0 : index
    %60 = vector.load %arg8[%c0_24, %c0_25] : memref<1x320xf32, #tpu.memory_space<vmem>>, vector<1x320xf32>
    %61 = vector.broadcast %60 : vector<1x320xf32> to vector<8x320xf32>
    %62 = arith.subf %59, %61 : vector<8x320xf32>
    %63 = math.tanh %62 : vector<8x320xf32>
    %64 = arith.mulf %63, %63 : vector<8x320xf32>
    %cst_26 = arith.constant 1.000000e+00 : f32
    %65 = vector.broadcast %cst_26 : f32 to vector<8x320xf32>
    %66 = arith.subf %65, %64 : vector<8x320xf32>
    %c0_27 = arith.constant 0 : index
    %c0_28 = arith.constant 0 : index
    %67 = vector.load %arg9[%c0_27, %c0_28] : memref<320x128xf32, #tpu.memory_space<vmem>>, vector<320x128xf32>
    %cst_29 = arith.constant dense<0.000000e+00> : vector<8x128xf32>
    %68 = tpu.matmul %66, %67, %cst_29 {dimension_numbers = #tpu.dot_dimension_numbers<[1], [0], [0], [1], [0, 0, 1, 1], [], []>} : vector<8x320xf32>, vector<320x128xf32>, vector<8x128xf32> -> vector<8x128xf32>
    %c0_30 = arith.constant 0 : index
    %c0_31 = arith.constant 0 : index
    %69 = vector.load %arg10[%c0_30, %c0_31] : memref<8x128xf32, #tpu.memory_space<vmem>>, vector<8x128xf32>
    tpu.vector_store %arg10[%c0_30, %c0_31], %68 {strides = array<i32>} : memref<8x128xf32, #tpu.memory_space<vmem>>, vector<8x128xf32>,
    return
  }
  func.func @transform_0(%arg0: i32) -> (i32, i32) {
    %c0_i32 = arith.constant 0 : i32
    %c0_i32_0 = arith.constant 0 : i32
    return %arg0, %c0_i32 : i32, i32
  }
  func.func @transform_1(%arg0: i32) -> (i32, i32) {
    %c0_i32 = arith.constant 0 : i32
    %c0_i32_0 = arith.constant 0 : i32
    %c0_i32_1 = arith.constant 0 : i32
    return %c0_i32, %c0_i32_0 : i32, i32
  }
  func.func @transform_2(%arg0: i32) -> (i32, i32) {
    %c0_i32 = arith.constant 0 : i32
    %c0_i32_0 = arith.constant 0 : i32
    %c0_i32_1 = arith.constant 0 : i32
    return %c0_i32, %c0_i32_0 : i32, i32
  }
  func.func @transform_3(%arg0: i32) -> (i32, i32) {
    %c0_i32 = arith.constant 0 : i32
    %c0_i32_0 = arith.constant 0 : i32
    %c0_i32_1 = arith.constant 0 : i32
    return %c0_i32, %c0_i32_0 : i32, i32
  }
  func.func @transform_4(%arg0: i32) -> (i32, i32) {
    %c0_i32 = arith.constant 0 : i32
    %c0_i32_0 = arith.constant 0 : i32
    %c0_i32_1 = arith.constant 0 : i32
    return %c0_i32, %c0_i32_0 : i32, i32
  }
  func.func @transform_5(%arg0: i32) -> (i32, i32) {
    %c0_i32 = arith.constant 0 : i32
    %c0_i32_0 = arith.constant 0 : i32
    %c0_i32_1 = arith.constant 0 : i32
    return %c0_i32, %c0_i32_0 : i32, i32
  }
  func.func @transform_6(%arg0: i32) -> (i32, i32) {
    %c0_i32 = arith.constant 0 : i32
    %c0_i32_0 = arith.constant 0 : i32
    %c0_i32_1 = arith.constant 0 : i32
    return %c0_i32, %c0_i32_0 : i32, i32
  }
  func.func @transform_7(%arg0: i32) -> (i32, i32) {
    %c0_i32 = arith.constant 0 : i32
    %c0_i32_0 = arith.constant 0 : i32
    %c0_i32_1 = arith.constant 0 : i32
    return %c0_i32, %c0_i32_0 : i32, i32
  }
  func.func @transform_8(%arg0: i32) -> (i32, i32) {
    %c0_i32 = arith.constant 0 : i32
    %c0_i32_0 = arith.constant 0 : i32
    %c0_i32_1 = arith.constant 0 : i32
    return %c0_i32, %c0_i32_0 : i32, i32
  }
  func.func @transform_9(%arg0: i32) -> (i32, i32) {
    %c0_i32 = arith.constant 0 : i32
    %c0_i32_0 = arith.constant 0 : i32
    return %arg0, %c0_i32 : i32, i32
  }
}

module attributes {stable_mosaic.version = 11 : i64} {
  func.func @_fasterkan_stack_kernel(%arg0: i32, %arg1: memref<8x32xf32, #tpu.memory_space<vmem>>, %arg2: memref<1x32xf32, #tpu.memory_space<vmem>>, %arg3: memref<1x32xf32, #tpu.memory_space<vmem>>, %arg4: memref<1x160xf32, #tpu.memory_space<vmem>>, %arg5: memref<160x64xf32, #tpu.memory_space<vmem>>, %arg6: memref<1x64xf32, #tpu.memory_space<vmem>>, %arg7: memref<1x64xf32, #tpu.memory_space<vmem>>, %arg8: memref<1x320xf32, #tpu.memory_space<vmem>>, %arg9: memref<320x128xf32, #tpu.memory_space<vmem>>, %arg10: memref<8x128xf32, #tpu.memory_space<vmem>>) attributes {dimension_semantics = [#tpu.dimension_semantics<parallel>], iteration_bounds = array<i64: 1>, scalar_prefetch = 0 : i64, scratch_operands = 0 : i64, tpu.core_type = #tpu.core_type<tc>, window_params = [{transform_indices = @transform_0, window_bounds = array<i64: 8, 32>}, {pipeline_mode = #tpu.pipeline_mode<synchronous>, transform_indices = @transform_1, window_bounds = array<i64: 1, 32>}, {pipeline_mode = #tpu.pipeline_mode<synchronous>, transform_indices = @transform_2, window_bounds = array<i64: 1, 32>}, {pipeline_mode = #tpu.pipeline_mode<synchronous>, transform_indices = @transform_3, window_bounds = array<i64: 1, 160>}, {pipeline_mode = #tpu.pipeline_mode<synchronous>, transform_indices = @transform_4, window_bounds = array<i64: 160, 64>}, {pipeline_mode = #tpu.pipeline_mode<synchronous>, transform_indices = @transform_5, window_bounds = array<i64: 1, 64>}, {pipeline_mode = #tpu.pipeline_mode<synchronous>, transform_indices = @transform_6, window_bounds = array<i64: 1, 64>}, {pipeline_mode = #tpu.pipeline_mode<synchronous>, transform_indices = @transform_7, window_bounds = array<i64: 1, 320>}, {pipeline_mode = #tpu.pipeline_mode<synchronous>, transform_indices = @transform_8, window_bounds = array<i64: 320, 128>}, {transform_indices = @transform_9, window_bounds = array<i64: 8, 128>}]} {
    %c0 = arith.constant 0 : index
    %c0_0 = arith.constant 0 : index
    %0 = vector.load %arg1[%c0, %c0_0] : memref<8x32xf32, #tpu.memory_space<vmem>>, vector<8x32xf32>
    %cst = arith.constant dense<0.000000e+00> : vector<8xf32>
    %1 = vector.multi_reduction <add>, %0, %cst [1] : vector<8x32xf32> to vector<8xf32>
    %2 = vector.shape_cast %1 : vector<8xf32> to vector<8x1xf32>
    %cst_1 = arith.constant 3.200000e+01 : f32
    %3 = vector.broadcast %cst_1 : f32 to vector<8x1xf32>
    %4 = arith.divf %2, %3 : vector<8x1xf32>
    %5 = vector.broadcast %4 : vector<8x1xf32> to vector<8x32xf32>
    %6 = arith.subf %0, %5 : vector<8x32xf32>
    %7 = arith.mulf %6, %6 : vector<8x32xf32>
    %cst_2 = arith.constant dense<0.000000e+00> : vector<8xf32>
    %8 = vector.multi_reduction <add>, %7, %cst_2 [1] : vector<8x32xf32> to vector<8xf32>
    %9 = vector.shape_cast %8 : vector<8xf32> to vector<8x1xf32>
    %cst_3 = arith.constant 3.200000e+01 : f32
    %10 = vector.broadcast %cst_3 : f32 to vector<8x1xf32>
    %11 = arith.divf %9, %10 : vector<8x1xf32>
    %12 = vector.broadcast %4 : vector<8x1xf32> to vector<8x32xf32>
    %13 = arith.subf %0, %12 : vector<8x32xf32>
    %cst_4 = arith.constant 9.99999974E-6 : f32
    %14 = vector.broadcast %cst_4 : f32 to vector<8x1xf32>
    %15 = arith.addf %11, %14 : vector<8x1xf32>
    %16 = math.rsqrt %15 : vector<8x1xf32>
    %17 = vector.broadcast %16 : vector<8x1xf32> to vector<8x32xf32>
    %18 = arith.mulf %13, %17 : vector<8x32xf32>
    %c0_5 = arith.constant 0 : index
    %c0_6 = arith.constant 0 : index
    %19 = vector.load %arg2[%c0_5, %c0_6] : memref<1x32xf32, #tpu.memory_space<vmem>>, vector<1x32xf32>
    %20 = vector.broadcast %19 : vector<1x32xf32> to vector<8x32xf32>
    %21 = arith.mulf %18, %20 : vector<8x32xf32>
    %c0_7 = arith.constant 0 : index
    %c0_8 = arith.constant 0 : index
    %22 = vector.load %arg3[%c0_7, %c0_8] : memref<1x32xf32, #tpu.memory_space<vmem>>, vector<1x32xf32>
    %23 = vector.broadcast %22 : vector<1x32xf32> to vector<8x32xf32>
    %24 = arith.addf %21, %23 : vector<8x32xf32>
    %25 = tpu.concatenate %24, %24, %24, %24, %24 in 1 : vector<8x32xf32>, vector<8x32xf32>, vector<8x32xf32>, vector<8x32xf32>, vector<8x32xf32> -> vector<8x160xf32>
    %c0_9 = arith.constant 0 : index
    %c0_10 = arith.constant 0 : index
    %26 = vector.load %arg4[%c0_9, %c0_10] : memref<1x160xf32, #tpu.memory_space<vmem>>, vector<1x160xf32>
    %27 = vector.broadcast %26 : vector<1x160xf32> to vector<8x160xf32>
    %28 = arith.subf %25, %27 : vector<8x160xf32>
    %29 = math.tanh %28 : vector<8x160xf32>
    %30 = arith.mulf %29, %29 : vector<8x160xf32>
    %cst_11 = arith.constant 1.000000e+00 : f32
    %31 = vector.broadcast %cst_11 : f32 to vector<8x160xf32>
    %32 = arith.subf %31, %30 : vector<8x160xf32>
    %c0_12 = arith.constant 0 : index
    %c0_13 = arith.constant 0 : index
    %33 = vector.load %arg5[%c0_12, %c0_13] : memref<160x64xf32, #tpu.memory_space<vmem>>, vector<160x64xf32>
    %cst_14 = arith.constant dense<0.000000e+00> : vector<8x64xf32>
    %34 = tpu.matmul %32, %33, %cst_14 {dimension_numbers = #tpu.dot_dimension_numbers<[1], [0], [0], [1], [0, 0, 1, 1], [], []>} : vector<8x160xf32>, vector<160x64xf32>, vector<8x64xf32> -> vector<8x64xf32>
    %cst_15 = arith.constant dense<0.000000e+00> : vector<8xf32>
    %35 = vector.multi_reduction <add>, %34, %cst_15 [1] : vector<8x64xf32> to vector<8xf32>
    %36 = vector.shape_cast %35 : vector<8xf32> to vector<8x1xf32>
    %cst_16 = arith.constant 6.400000e+01 : f32
    %37 = vector.broadcast %cst_16 : f32 to vector<8x1xf32>
    %38 = arith.divf %36, %37 : vector<8x1xf32>
    %39 = vector.broadcast %38 : vector<8x1xf32> to vector<8x64xf32>
    %40 = arith.subf %34, %39 : vector<8x64xf32>
    %41 = arith.mulf %40, %40 : vector<8x64xf32>
    %cst_17 = arith.constant dense<0.000000e+00> : vector<8xf32>
    %42 = vector.multi_reduction <add>, %41, %cst_17 [1] : vector<8x64xf32> to vector<8xf32>
    %43 = vector.shape_cast %42 : vector<8xf32> to vector<8x1xf32>
    %cst_18 = arith.constant 6.400000e+01 : f32
    %44 = vector.broadcast %cst_18 : f32 to vector<8x1xf32>
    %45 = arith.divf %43, %44 : vector<8x1xf32>
    %46 = vector.broadcast %38 : vector<8x1xf32> to vector<8x64xf32>
    %47 = arith.subf %34, %46 : vector<8x64xf32>
    %cst_19 = arith.constant 9.99999974E-6 : f32
    %48 = vector.broadcast %cst_19 : f32 to vector<8x1xf32>
    %49 = arith.addf %45, %48 : vector<8x1xf32>
    %50 = math.rsqrt %49 : vector<8x1xf32>
    %51 = vector.broadcast %50 : vector<8x1xf32> to vector<8x64xf32>
    %52 = arith.mulf %47, %51 : vector<8x64xf32>
    %c0_20 = arith.constant 0 : index
    %c0_21 = arith.constant 0 : index
    %53 = vector.load %arg6[%c0_20, %c0_21] : memref<1x64xf32, #tpu.memory_space<vmem>>, vector<1x64xf32>
    %54 = vector.broadcast %53 : vector<1x64xf32> to vector<8x64xf32>
    %55 = arith.mulf %52, %54 : vector<8x64xf32>
    %c0_22 = arith.constant 0 : index
    %c0_23 = arith.constant 0 : index
    %56 = vector.load %arg7[%c0_22, %c0_23] : memref<1x64xf32, #tpu.memory_space<vmem>>, vector<1x64xf32>
    %57 = vector.broadcast %56 : vector<1x64xf32> to vector<8x64xf32>
    %58 = arith.addf %55, %57 : vector<8x64xf32>
    %59 = tpu.concatenate %58, %58, %58, %58, %58 in 1 : vector<8x64xf32>, vector<8x64xf32>, vector<8x64xf32>, vector<8x64xf32>, vector<8x64xf32> -> vector<8x320xf32>
    %c0_24 = arith.constant 0 : index
    %c0_25 = arith.constant 0 : index
    %60 = vector.load %arg8[%c0_24, %c0_25] : memref<1x320xf32, #tpu.memory_space<vmem>>, vector<1x320xf32>
    %61 = vector.broadcast %60 : vector<1x320xf32> to vector<8x320xf32>
    %62 = arith.subf %59, %61 : vector<8x320xf32>
    %63 = math.tanh %62 : vector<8x320xf32>
    %64 = arith.mulf %63, %63 : vector<8x320xf32>
    %cst_26 = arith.constant 1.000000e+00 : f32
    %65 = vector.broadcast %cst_26 : f32 to vector<8x320xf32>
    %66 = arith.subf %65, %64 : vector<8x320xf32>
    %c0_27 = arith.constant 0 : index
    %c0_28 = arith.constant 0 : index
    %67 = vector.load %arg9[%c0_27, %c0_28] : memref<320x128xf32, #tpu.memory_space<vmem>>, vector<320x128xf32>
    %cst_29 = arith.constant dense<0.000000e+00> : vector<8x128xf32>
    %68 = tpu.matmul %66, %67, %cst_29 {dimension_numbers = #tpu.dot_dimension_numbers<[1], [0], [0], [1], [0, 0, 1, 1], [], []>} : vector<8x320xf32>, vector<320x128xf32>, vector<8x128xf32> -> vector<8x128xf32>
    %c0_30 = arith.constant 0 : index
    %c0_31 = arith.constant 0 : index
    %69 = vector.load %arg10[%c0_30, %c0_31] : memref<8x128xf32, #tpu.memory_space<vmem>>, vector<8x128xf32>
    tpu.vector_store %arg10[%c0_30, %c0_31], %68 {strides = array<i32>} : memref<8x128xf32, #tpu.memory_space<vmem>>, vector<8x128xf32>,
    return
  }
  func.func @transform_0(%arg0: i32) -> (i32, i32) {
    %c0_i32 = arith.constant 0 : i32
    %c0_i32_0 = arith.constant 0 : i32
    return %arg0, %c0_i32 : i32, i32
  }
  func.func @transform_1(%arg0: i32) -> (i32, i32) {
    %c0_i32 = arith.constant 0 : i32
    %c0_i32_0 = arith.constant 0 : i32
    %c0_i32_1 = arith.constant 0 : i32
    return %c0_i32, %c0_i32_0 : i32, i32
  }
  func.func @transform_2(%arg0: i32) -> (i32, i32) {
    %c0_i32 = arith.constant 0 : i32
    %c0_i32_0 = arith.constant 0 : i32
    %c0_i32_1 = arith.constant 0 : i32
    return %c0_i32, %c0_i32_0 : i32, i32
  }
  func.func @transform_3(%arg0: i32) -> (i32, i32) {
    %c0_i32 = arith.constant 0 : i32
    %c0_i32_0 = arith.constant 0 : i32
    %c0_i32_1 = arith.constant 0 : i32
    return %c0_i32, %c0_i32_0 : i32, i32
  }
  func.func @transform_4(%arg0: i32) -> (i32, i32) {
    %c0_i32 = arith.constant 0 : i32
    %c0_i32_0 = arith.constant 0 : i32
    %c0_i32_1 = arith.constant 0 : i32
    return %c0_i32, %c0_i32_0 : i32, i32
  }
  func.func @transform_5(%arg0: i32) -> (i32, i32) {
    %c0_i32 = arith.constant 0 : i32
    %c0_i32_0 = arith.constant 0 : i32
    %c0_i32_1 = arith.constant 0 : i32
    return %c0_i32, %c0_i32_0 : i32, i32
  }
  func.func @transform_6(%arg0: i32) -> (i32, i32) {
    %c0_i32 = arith.constant 0 : i32
    %c0_i32_0 = arith.constant 0 : i32
    %c0_i32_1 = arith.constant 0 : i32
    return %c0_i32, %c0_i32_0 : i32, i32
  }
  func.func @transform_7(%arg0: i32) -> (i32, i32) {
    %c0_i32 = arith.constant 0 : i32
    %c0_i32_0 = arith.constant 0 : i32
    %c0_i32_1 = arith.constant 0 : i32
    return %c0_i32, %c0_i32_0 : i32, i32
  }
  func.func @transform_8(%arg0: i32) -> (i32, i32) {
    %c0_i32 = arith.constant 0 : i32
    %c0_i32_0 = arith.constant 0 : i32
    %c0_i32_1 = arith.constant 0 : i32
    return %c0_i32, %c0_i32_0 : i32, i32
  }
  func.func @transform_9(%arg0: i32) -> (i32, i32) {
    %c0_i32 = arith.constant 0 : i32
    %c0_i32_0 = arith.constant 0 : i32
    return %arg0, %c0_i32 : i32, i32
  }
}

</mosaic_0001>

<bundles_post_ra>
// kernel: tpu_custom_call.1
= control target key start
LH: loop header
LB: loop body
LE: loop exit
PB: predicated region body
PF: predicated region fallthrough
CT: control target
= control target key end

     0   :  { %14 = vsyncpa [#allocation3], 0  ;;  %s893_s0 = inlined_call_operand.vmem [shape: f32[8,32], index: 0, kind: input, shape index: {}]   ;;  %s894_s1 = inlined_call_operand.vmem [shape: f32[1,32], index: 1, kind: input, shape index: {}]   ;;  %s895_s2 = inlined_call_operand.vmem [shape: f32[1,32], index: 2, kind: input, shape index: {}]   ;;  %s896_s3 = inlined_call_operand.vmem [shape: f32[1,160], index: 3, kind: input, shape index: {}]   ;;  %s897_s4 = inlined_call_operand.vmem [shape: f32[160,64], index: 4, kind: input, shape index: {}]   ;;  %s898_s5 = inlined_call_operand.vmem [shape: f32[1,64], index: 5, kind: input, shape index: {}]   ;;  %s899_s6 = inlined_call_operand.vmem [shape: f32[1,64], index: 6, kind: input, shape index: {}]   ;;  %s900_s7 = inlined_call_operand.vmem [shape: f32[1,320], index: 7, kind: input, shape index: {}]   ;;  %s901_s8 = inlined_call_operand.hbm [shape: f32[320,128], index: 8, kind: input, shape index: {}]   ;;  %s902_s9 = inlined_call_operand.hbm [shape: f32[8,128], index: 9, kind: output, shape index: {}]  }
   0x1   :  { %15 = vsyncpa [#allocation4], 0  ;;  %s685_s30 = smov [#allocation2]   ;;  %s637_s13 = scalar_lea.hbm %s901_s8, 5120 }
   0x2   :  { %s37_s10 = sshll.u32 %s685_s30, 4  ;;  %p638_p0 = scmp.ne.s32.totalorder %s901_s8, %s637_s13  ;;  %s38_s10 = int_to_ptr.vmem [resolvable:$true] %s37_s10 }
   0x3   :  { %p641_p1 = scmp.lt.u32.totalorder %s637_s13, %s901_s8 }
   0x5   :  { %p643_p2 = pnand %p641_p1, %p638_p0 }
   0x7   :  { %646 = shalt.err (!%p643_p2)
}
   0x8   :  { %s647_s18 = scalar_lea.vmem %s38_s10, 5120  ;;  %p652_p4 = scmp.lt.s32.totalorder %s38_s10, %s38_s10 }
   0x9   :  { %p648_p3 = scmp.ne.s32.totalorder %s38_s10, %s647_s18  ;;  %p653_p5 = scmp.lt.s32.totalorder %s647_s18, %s647_s18 }
   0xb   :  { %p654_p6 = por %p653_p5, %p652_p4 }
   0xd   :  { %p655_p7 = pnand %p654_p6, %p648_p3 }
   0xf   :  { %658 = shalt.err (!%p655_p7)
}
  0x10   :  { %s686_s19 = smov 128   ;;  %s687_s20 = smov 8  }
  0x11   :  { %43 = dma.hbm_to_vmem [thread:$0]  %s901_s8, 5120, %s38_s10, [#allocation3], %s686_s19, %s686_s19, %s687_s20  }
  0x12   :  { %681 = dma.done.wait [#allocation3], 5120  }
  0x13   :  { %682 = vsyncadd [#allocation3], 4294962176  ;;  %vm48_vm0 = vcmask 261120   ;;  %v47_v0 = vld [vmem:[%s893_s0] sm:$0xff]  ;;  %v115_v8 = vld [vmem:[%s897_s4 + $0x8] sm:$0xff]  ;;  %v688_v10 = vmov 0.0|0.0   ;;  %v96_v23 = vlaneseq }
  0x14   :  { %v49_v1 = vsel %vm48_vm0, %v47_v0, 0.0  ;;  %v114_v7 = vld [vmem:[%s897_s4] sm:$0xff]  ;;  %v116_v9 = vld [vmem:[%s897_s4 + $0x10] sm:$0xff]  ;;  %539 = vmatprep.subr.bf16.mxu0 %v688_v10  ;;  %v117_v12 = vld [vmem:[%s897_s4 + $0x18] sm:$0xff]  ;;  %s689_s18 = smov 96   ;;  %s690_s19 = smov 32  }
  0x15   :  { %50 = vadd.xlane.f32.xlu0 %v49_v1  ;;  %v540_v11 = vpack.c.bf16 %v115_v8, %v114_v7  ;;  %v543_v13 = vpack.c.bf16 %v117_v12, %v116_v9  ;;  %v118_v14 = vld [vmem:[%s897_s4 + $0x20] sm:$0xff]  ;;  %v119_v15 = vld [vmem:[%s897_s4 + $0x28] sm:$0xff]  ;;  %v120_v17 = vld [vmem:[%s897_s4 + $0x30] sm:$0xff]  ;;  %v797_v27 = vshrl.u32 %v96_v23, 7  ;;  %s691_s24 = smov 64   ;;  %vm90_vm1 = vcmask 523264  }
  0x16   :  { %v546_v16 = vpack.c.bf16 %v119_v15, %v118_v14  ;;  %v121_v18 = vld [vmem:[%s897_s4 + $0x38] sm:$0xff]  ;;  %v122_v24 = vld [vmem:[%s897_s4 + $0x40] sm:$0xff]  ;;  %v123_v25 = vld [vmem:[%s897_s4 + $0x48] sm:$0xff]  ;;  %vm92_vm2 = vcmask 785408   ;;  %vm692_vm3 = vmmov 0  }
  0x17   :  { %541 = vmatpush1.bf16.msra.mxu0 %v540_v11  ;;  %v549_v19 = vpack.c.bf16 %v121_v18, %v120_v17  ;;  %v552_v26 = vpack.c.bf16 %v123_v25, %v122_v24  ;;  %v124_v28 = vld [vmem:[%s897_s4 + $0x50] sm:$0xff]  ;;  %v125_v29 = vld [vmem:[%s897_s4 + $0x58] sm:$0xff]  ;;  %v102_v31 = vsub.s32 1, %v797_v27  ;;  %v126_v32 = vld [vmem:[%s897_s4 + $0x60] sm:$0xff]  ;;  %v98_v56 = vsub.s32 0, %v797_v27 }
  0x18   :  { %542 = vmatprep.subr.bf16.mxu0 %v688_v10  ;;  %v555_v30 = vpack.c.bf16 %v125_v29, %v124_v28  ;;  %v127_v33 = vld [vmem:[%s897_s4 + $0x68] sm:$0xff]  ;;  %v470_v35 = vld [vmem:[%s894_s1] ss:$0 sm:$0xff]  ;;  %v128_v40 = vld [vmem:[%s897_s4 + $0x70] sm:$0xff] }
  0x19   :  { %v94_v36 = vld [vmem:[%s896_s3] sm:$0x3]  ;;  %v558_v37 = vpack.c.bf16 %v127_v33, %v126_v32  ;;  %v129_v41 = vld [vmem:[%s897_s4 + $0x78] sm:$0xff]  ;;  %v131_v46 = vld [vmem:[%s897_s4 + $0x88] sm:$0xff] }
  0x1a   :  { %v471_v39 = vld [vmem:[%s895_s2] ss:$0 sm:$0xff]  ;;  %v103_v43 = vrot.slane %v94_v36, %v102_v31  ;;  %v561_v44 = vpack.c.bf16 %v129_v41, %v128_v40  ;;  %v132_v50 = vld [vmem:[%s897_s4 + $0x90] sm:$0xff]  ;;  %v133_v51 = vld [vmem:[%s897_s4 + $0x98] sm:$0xff]  ;;  %v99_v58 = vrot.slane %v94_v36, %v98_v56 }
  0x1b   :  { %544 = vmatpush1.bf16.msra.mxu0 %v543_v13  ;;  %v130_v45 = vld [vmem:[%s897_s4 + $0x80] sm:$0xff]  ;;  %v567_v52 = vpack.c.bf16 %v133_v51, %v132_v50  ;;  %v288_v14 = vld [vmem:[#allocation2 + $0x88] sm:$0xff]  ;;  %v289_v18 = vld [vmem:[#allocation2 + $0x90] sm:$0xff] }
  0x1c   :  { %545 = vmatprep.subr.bf16.mxu0 %v688_v10  ;;  %v564_v48 = vpack.c.bf16 %v131_v46, %v130_v45  ;;  %v287_v13 = vld [vmem:[#allocation2 + $0x80] sm:$0xff]  ;;  %v272_v17 = vld [vmem:[#allocation2 + $0x8] sm:$0xff]  ;;  %v274_v23 = vld [vmem:[#allocation2 + $0x18] sm:$0xff] }
  0x1d   :  { %v271_v15 = vld [vmem:[#allocation2] sm:$0xff]  ;;  %v292_v25 = vld [vmem:[#allocation2 + $0xa8] sm:$0xff]  ;;  %v293_v32 = vld [vmem:[#allocation2 + $0xb0] sm:$0xff] }
  0x1e   :  { %v291_v24 = vld [vmem:[#allocation2 + $0xa0] sm:$0xff]  ;;  %v294_v33 = vld [vmem:[#allocation2 + $0xb8] sm:$0xff]  ;;  %v277_v36 = vld [vmem:[#allocation2 + $0x30] sm:$0xff] }
  0x1f   :  { %547 = vmatpush1.bf16.msra.mxu0 %v546_v16  ;;  %v569_v16 = vpack.c.bf16 %v288_v14, %v287_v13  ;;  %v577_v28 = vpack.c.bf16 %v292_v25, %v291_v24  ;;  %v275_v29 = vld [vmem:[#allocation2 + $0x20] sm:$0xff]  ;;  %v280_v46 = vld [vmem:[#allocation2 + $0x48] sm:$0xff]  ;;  %v281_v50 = vld [vmem:[#allocation2 + $0x50] sm:$0xff] }
  0x20   :  { %548 = vmatprep.subr.bf16.mxu0 %v688_v10  ;;  %v279_v45 = vld [vmem:[#allocation2 + $0x40] sm:$0xff]  ;;  %v304_v24 = vld [vmem:[#allocation2 + $0x108] sm:$0xff] }
  0x21   :  { %570 = vmatprep.subr.bf16.mxu1 %v569_v16 }
  0x23   :  { %550 = vmatpush1.bf16.msra.mxu0 %v549_v19  ;;  %v290_v19 = vld [vmem:[#allocation2 + $0x98] sm:$0xff] }
  0x24   :  { %551 = vmatprep.subr.bf16.mxu0 %v688_v10 }
  0x27   :  { %553 = vmatpush1.bf16.msra.mxu0 %v552_v26 }
  0x28   :  { %554 = vmatprep.subr.bf16.mxu0 %v688_v10 }
  0x2b   :  { %556 = vmatpush1.bf16.msra.mxu0 %v555_v30  ;;  %v276_v30 = vld [vmem:[#allocation2 + $0x28] sm:$0xff] }
  0x2c   :  { %557 = vmatprep.subr.bf16.mxu0 %v688_v10 }
  0x2f   :  { %559 = vmatpush1.bf16.msra.mxu0 %v558_v37  ;;  %v278_v37 = vld [vmem:[#allocation2 + $0x38] sm:$0xff] }
  0x30   :  { %560 = vmatprep.subr.bf16.mxu0 %v688_v10 }
  0x33   :  { %562 = vmatpush1.bf16.msra.mxu0 %v561_v44 }
  0x34   :  { %563 = vmatprep.subr.bf16.mxu0 %v688_v10 }
  0x37   :  { %565 = vmatpush1.bf16.msra.mxu0 %v564_v48  ;;  %v297_v48 = vld [vmem:[#allocation2 + $0xd0] sm:$0xff] }
  0x38   :  { %566 = vmatprep.subr.bf16.mxu0 %v688_v10 }
  0x3b   :  { %568 = vmatpush1.bf16.msra.mxu0 %v567_v52  ;;  %v282_v52 = vld [vmem:[#allocation2 + $0x58] sm:$0xff] }
  0xa2   :  { %v51_v2 = vpop.xlane.xlu0 %50 }
  0xa3   :  { %v53_v3 = vmul.f32 0.03125, %v51_v2 }
  0xa5   :  { %v54_v4 = vsub.f32 %v47_v0, %v53_v3 }
  0xa7   :  { %v55_v5 = vmul.f32 %v54_v4, %v54_v4 }
  0xa9   :  { %v56_v6 = vsel %vm48_vm0, %v55_v5, 0.0 }
  0xaa   :  { %57 = vadd.xlane.f32.xlu0 %v56_v6 }
 0x137   :  { %v58_v20 = vpop.xlane.xlu0 %57 }
 0x138   :  { %v59_v21 = vmul.f32 0.03125, %v58_v20  ;;  %v571_v20 = vpack.c.bf16 %v272_v17, %v271_v15  ;;  %v254_v17 = vsub.s32 2, %v797_v27  ;;  %v693_v27 = vmov 0.0  }
 0x13a   :  { %v60_v22 = vadd.f32 1e-05, %v59_v21  ;;  %v573_v21 = vpack.c.bf16 %v290_v19, %v289_v18  ;;  %572 = vmatpush3.bf16.msra.mxu1 %v571_v20 }
 0x13c   :  { %623 = vrsqrt.f32 %v60_v22  ;;  %v273_v22 = vld [vmem:[#allocation2 + $0x10] sm:$0xff]  ;;  %574 = vmatprep.subr.bf16.mxu1 %v573_v21 }
 0x13d   :  { %v575_v26 = vpack.c.bf16 %v274_v23, %v273_v22  ;;  %v303_v23 = vld [vmem:[#allocation2 + $0x100] sm:$0xff] }
 0x13f   :  { %576 = vmatpush3.bf16.msra.mxu1 %v575_v26  ;;  %v602_v26 = vpack.c.bf16 %v304_v24, %v303_v23 }
 0x140   :  { %578 = vmatprep.subr.bf16.mxu1 %v577_v28  ;;  %v305_v28 = vld [vmem:[#allocation2 + $0x110] sm:$0xff] }
 0x146   :  { %v624_v34 = vpop.eup %623 }
 0x147   :  { %v62_v38 = vmul.f32 %v624_v34, %v54_v4  ;;  %v579_v34 = vpack.c.bf16 %v276_v30, %v275_v29  ;;  %v306_v29 = vld [vmem:[#allocation2 + $0x118] sm:$0xff] }
 0x148   :  { %v605_v30 = vpack.c.bf16 %v306_v29, %v305_v28 }
 0x149   :  { %v70_v42 = vmul.f32 %v470_v35, %v62_v38  ;;  %v581_v35 = vpack.c.bf16 %v294_v33, %v293_v32  ;;  %580 = vmatpush3.bf16.msra.mxu1 %v579_v34  ;;  %v583_v38 = vpack.c.bf16 %v278_v37, %v277_v36  ;;  %v307_v32 = vld [vmem:[#allocation2 + $0x120] sm:$0xff]  ;;  %v308_v33 = vld [vmem:[#allocation2 + $0x128] sm:$0xff]  ;;  %v310_v36 = vld [vmem:[#allocation2 + $0x138] sm:$0xff] }
 0x14a   :  { %v608_v34 = vpack.c.bf16 %v308_v33, %v307_v32 }
 0x14b   :  { %v78_v47 = vadd.f32 %v471_v39, %v70_v42  ;;  %582 = vmatprep.subr.bf16.mxu1 %v581_v35  ;;  %v295_v42 = vld [vmem:[#allocation2 + $0xc0] sm:$0xff]  ;;  %v309_v35 = vld [vmem:[#allocation2 + $0x130] sm:$0xff] }
 0x14d   :  { %86 = vrot.lane.b32.xlu0 %v78_v47, %s689_s18  ;;  %80 = vrot.lane.b32.xlu1 %v78_v47, %s690_s19  ;;  %v107_v49 = vsub.f32 %v78_v47, %v103_v43  ;;  %v296_v43 = vld [vmem:[#allocation2 + $0xc8] sm:$0xff] }
 0x14e   :  { %584 = vmatpush3.bf16.msra.mxu1 %v583_v38  ;;  %v585_v44 = vpack.c.bf16 %v296_v43, %v295_v42  ;;  %v611_v38 = vpack.c.bf16 %v310_v36, %v309_v35 }
 0x14f   :  { %625 = vtanh.f32 %v107_v49  ;;  %v298_v49 = vld [vmem:[#allocation2 + $0xd8] sm:$0xff] }
 0x150   :  { %586 = vmatprep.subr.bf16.mxu1 %v585_v44  ;;  %v589_v51 = vpack.c.bf16 %v298_v49, %v297_v48 }
 0x151   :  { %83 = vrot.lane.b32.xlu1 %v78_v47, %s691_s24 }
 0x159   :  { %v626_v53 = vpop.eup %625 }
 0x15a   :  { %v111_v54 = vmul.f32 %v626_v53, %v626_v53  ;;  %v299_v53 = vld [vmem:[#allocation2 + $0xe0] sm:$0xff] }
 0x15c   :  { %v113_v55 = vsub.f32 1.0, %v111_v54  ;;  %v300_v54 = vld [vmem:[#allocation2 + $0xe8] sm:$0xff] }
 0x15e   :  { %472 = vmatprep.mubr.msk.f32.mxu0 %vm48_vm0, %v113_v55  ;;  %v591_v55 = vpack.c.bf16 %v282_v52, %v281_v50 }
 0x1bf   :  { %v81_v57 = vpop.permute.xlu1 %80  ;;  %v87_v61 = vpop.permute.xlu0 %86 }
 0x1c0   :  { %v89_v59 = vsel %vm48_vm0, %v78_v47, %v81_v57  ;;  %v587_v47 = vpack.c.bf16 %v280_v46, %v279_v45  ;;  %v593_v57 = vpack.c.bf16 %v300_v54, %v299_v53 }
 0x1c2   :  { %588 = vmatpush3.bf16.msra.mxu1 %v587_v47 }
 0x1c3   :  { %v84_v60 = vpop.permute.xlu1 %83  ;;  %590 = vmatprep.subr.bf16.mxu1 %v589_v51 }
 0x1c4   :  { %v91_v62 = vsel %vm90_vm1, %v89_v59, %v84_v60  ;;  %v284_v59 = vld [vmem:[#allocation2 + $0x68] sm:$0xff]  ;;  %v301_v60 = vld [vmem:[#allocation2 + $0xf0] sm:$0xff] }
 0x1c5   :  { %v93_v63 = vsel %vm92_vm2, %v91_v62, %v87_v61  ;;  %v473_v62 = vld [vmem:[%s898_s5] ss:$0 sm:$0xff] }
 0x1c6   :  { %v106_v0 = vsub.f32 %v93_v63, %v99_v58  ;;  %v283_v58 = vld [vmem:[#allocation2 + $0x60] sm:$0xff]  ;;  %v302_v63 = vld [vmem:[#allocation2 + $0xf8] sm:$0xff]  ;;  %592 = vmatpush3.bf16.msra.mxu1 %v591_v55 }
 0x1c7   :  { %594 = vmatprep.subr.bf16.mxu1 %v593_v57 }
 0x1c8   :  { %627 = vtanh.f32 %v106_v0 }
 0x1d2   :  { %v628_v1 = vpop.eup %627 }
 0x1d3   :  { %v110_v2 = vmul.f32 %v628_v1, %v628_v1  ;;  %v595_v1 = vpack.c.bf16 %v284_v59, %v283_v58 }
 0x1d5   :  { %v112_v3 = vsub.f32 1.0, %v110_v2  ;;  %v474_v2 = vld [vmem:[%s899_s6] ss:$0 sm:$0xff]  ;;  %596 = vmatpush3.bf16.msra.mxu1 %v595_v1  ;;  %s694_s6 = smov [#allocation5]  }
 0x1d7   :  { %202 = vmatmul.mubr.f32.vlgmr.msra.gmra.mrb[0].mxu0 %v112_v3  ;;  %v597_v3 = vpack.c.bf16 %v302_v63, %v301_v60 }
 0x1d9   :  { %598 = vmatprep.subr.bf16.mxu1 %v597_v3 }
 0x2aa   :  { %v203_v4 = vpop.f32.mrb[0].mxu0 }
 0x2ab   :  { %v205_v5 = vpop.f32.mrb[1].mxu0  ;;  %v207_v6 = vsel %vm90_vm1, %v203_v4, 0.0 }
 0x2ac   :  { %208 = vadd.xlane.f32.xlu1 %v207_v6  ;;  %v286_v5 = vld [vmem:[#allocation2 + $0x78] sm:$0xff] }
 0x339   :  { %v209_v7 = vpop.xlane.xlu1 %208 }
 0x33a   :  { %v211_v8 = vmul.f32 0.015625, %v209_v7 }
 0x33c   :  { %v854_v9 = vsub.f32 %v203_v4, %v211_v8  ;;  %v285_v4 = vld [vmem:[#allocation2 + $0x70] sm:$0xff] }
 0x33d   :  { %v599_v8 = vpack.c.bf16 %v286_v5, %v285_v4 }
 0x33e   :  { %v213_v11 = vmul.f32 %v854_v9, %v854_v9 }
 0x33f   :  { %600 = vmatpush3.bf16.msra.mxu1 %v599_v8 }
 0x340   :  { %v214_v12 = vsel %vm90_vm1, %v213_v11, 0.0  ;;  %601 = vmatprep.subr.bf16.mxu1 %v688_v10 }
 0x341   :  { %215 = vadd.xlane.f32.xlu0 %v214_v12 }
 0x3ce   :  { %v216_v39 = vpop.xlane.xlu0 %215 }
 0x3cf   :  { %v217_v40 = vmul.f32 0.015625, %v216_v39 }
 0x3d1   :  { %v218_v41 = vadd.f32 1e-05, %v217_v40 }
 0x3d3   :  { %629 = vrsqrt.f32 %v218_v41 }
 0x3dd   :  { %v630_v61 = vpop.eup %629 }
 0x3de   :  { %v220_v0 = vmul.f32 %v630_v61, %v854_v9  ;;  %v242_v9 = vld [vmem:[%s900_s7] sm:$0x7]  ;;  %s461_s7 = sshll.u32 %s694_s6, 4  ;;  %s462_s7 = int_to_ptr.vmem [resolvable:$true] %s461_s7 }
 0x3df   :  { %v247_v11 = vrot.slane %v242_v9, %v98_v56  ;;  %v251_v12 = vrot.slane %v242_v9, %v102_v31  ;;  %v255_v18 = vrot.slane %v242_v9, %v254_v17  ;;  %s659_s28 = scalar_lea.vmem %s462_s7, 128  ;;  %p664_p9 = scmp.lt.s32.totalorder %s462_s7, %s462_s7 }
 0x3e0   :  { %v228_v6 = vmul.f32 %v473_v62, %v220_v0  ;;  %p660_p8 = scmp.ne.s32.totalorder %s462_s7, %s659_s28  ;;  %p665_p10 = scmp.lt.s32.totalorder %s659_s28, %s659_s28 }
 0x3e2   :  { %v236_v7 = vadd.f32 %v474_v2, %v228_v6  ;;  %p666_p11 = por %p665_p10, %p664_p9 }
 0x3e4   :  { %238 = vrot.lane.b32.xlu1 %v236_v7, %s691_s24  ;;  %v261_v20 = vsub.f32 %v236_v7, %v255_v18  ;;  %p667_p12 = pnand %p666_p11, %p660_p8 }
 0x456   :  { %v239_v13 = vpop.permute.xlu1 %238 }
 0x457   :  { %v241_v14 = vsel %vm90_vm1, %v236_v7, %v239_v13 }
 0x458   :  { %v259_v15 = vsub.f32 %v241_v14, %v247_v11  ;;  %v260_v16 = vsub.f32 %v241_v14, %v251_v12 }
 0x45a   :  { %631 = vtanh.f32 %v259_v15 }
 0x45b   :  { %633 = vtanh.f32 %v260_v16 }
 0x45c   :  { %635 = vtanh.f32 %v261_v20 }
 0x464   :  { %v632_v19 = vpop.eup %631 }
 0x465   :  { %v634_v21 = vpop.eup %633  ;;  %v265_v22 = vmul.f32 %v632_v19, %v632_v19 }
 0x466   :  { %v266_v56 = vmul.f32 %v634_v21, %v634_v21  ;;  %v636_v37 = vpop.eup %635 }
 0x467   :  { %v268_v25 = vsub.f32 1.0, %v265_v22  ;;  %v267_v39 = vmul.f32 %v636_v37, %v636_v37 }
 0x468   :  { %v269_v31 = vsub.f32 1.0, %v266_v56 }
 0x469   :  { %v270_v40 = vsub.f32 1.0, %v267_v39 }
 0x46a   :  { %378 = vmatprep.mubr.f32.mxu1 %v269_v31 }
 0x46b   :  { %379 = vmatmul.mubr.f32.vlgmr.msra.gmra.mrb[0].mxu1 %v268_v25 }
 0x46c   :  { %603 = vmatpush3.bf16.msra.mxu1 %v602_v26  ;;  %536 = vmatprep.mubr.msk.f32.mxu1 %vm692_vm3, %v693_v27 }
 0x46d   :  { %604 = vmatprep.subr.bf16.mxu1 %v688_v10 }
 0x470   :  { %606 = vmatpush3.bf16.msra.mxu1 %v605_v30 }
 0x471   :  { %607 = vmatprep.subr.bf16.mxu1 %v688_v10 }
 0x474   :  { %609 = vmatpush3.bf16.msra.mxu1 %v608_v34 }
 0x475   :  { %610 = vmatprep.subr.bf16.mxu1 %v688_v10 }
 0x478   :  { %612 = vmatpush3.bf16.msra.mxu1 %v611_v38 }
 0x47b   :  { %537 = vmatmul.mubr.msk.f32.vlgmr.msra.gmra.mrb[2].mxu1 %vm90_vm1, %v270_v40 }
 0x53e   :  { %v508_v41 = vpop.f32.mrb[0].mxu1 }
 0x53f   :  { %v509_v42 = vpop.f32.mrb[1].mxu1 }
 0x540   :  { %v510_v43 = vadd.f32 %v509_v42, %v508_v41 }
 0x54e   :  { %v450_v44 = vpop.f32.mrb[2].mxu1 }
 0x54f   :  { %v451_v45 = vadd.f32 %v510_v43, %v450_v44  ;;  %v538_v46 = vpop.f32.mrb[3].mxu1 }
 0x551   :  { %454 = vst [vmem:[#allocation5] sm:$0xff] %v451_v45 }
 0x552   :  { %670 = shalt.err (!%p667_p12)
}
 0x553   :  { %s671_s30 = scalar_lea.hbm %s902_s9, 128 }
 0x554   :  { %p672_p13 = scmp.ne.s32.totalorder %s902_s9, %s671_s30  ;;  %p675_p0 = scmp.lt.u32.totalorder %s671_s30, %s902_s9 }
 0x556   :  { %p677_p1 = pnand %p675_p0, %p672_p13 }
 0x558   :  { %680 = shalt.err (!%p677_p1)
}
 0x559   :  { %464 = dma.vmem_to_hbm [thread:$0]  %s462_s7, 128, %s902_s9, [#allocation4]  }
 0x55a   :  { %683 = dma.done.wait [#allocation4], 128  }
 0x55b   :  { %684 = vsyncadd [#allocation4], 4294967168 }
 0x55c   :  { %468 = vsyncpa [#allocation3], 1 }
 0x55d   :  { %469 = vsyncpa [#allocation4], 1 }

// kernel: tpu_custom_call.1
= control target key start
LH: loop header
LB: loop body
LE: loop exit
PB: predicated region body
PF: predicated region fallthrough
CT: control target
= control target key end

     0   :  { %14 = vsyncpa [#allocation3], 0  ;;  %s893_s0 = inlined_call_operand.vmem [shape: f32[8,32], index: 0, kind: input, shape index: {}]   ;;  %s894_s1 = inlined_call_operand.vmem [shape: f32[1,32], index: 1, kind: input, shape index: {}]   ;;  %s895_s2 = inlined_call_operand.vmem [shape: f32[1,32], index: 2, kind: input, shape index: {}]   ;;  %s896_s3 = inlined_call_operand.vmem [shape: f32[1,160], index: 3, kind: input, shape index: {}]   ;;  %s897_s4 = inlined_call_operand.vmem [shape: f32[160,64], index: 4, kind: input, shape index: {}]   ;;  %s898_s5 = inlined_call_operand.vmem [shape: f32[1,64], index: 5, kind: input, shape index: {}]   ;;  %s899_s6 = inlined_call_operand.vmem [shape: f32[1,64], index: 6, kind: input, shape index: {}]   ;;  %s900_s7 = inlined_call_operand.vmem [shape: f32[1,320], index: 7, kind: input, shape index: {}]   ;;  %s901_s8 = inlined_call_operand.hbm [shape: f32[320,128], index: 8, kind: input, shape index: {}]   ;;  %s902_s9 = inlined_call_operand.hbm [shape: f32[8,128], index: 9, kind: output, shape index: {}]  }
   0x1   :  { %15 = vsyncpa [#allocation4], 0  ;;  %s685_s30 = smov [#allocation2]   ;;  %s637_s13 = scalar_lea.hbm %s901_s8, 5120 }
   0x2   :  { %s37_s10 = sshll.u32 %s685_s30, 4  ;;  %p638_p0 = scmp.ne.s32.totalorder %s901_s8, %s637_s13  ;;  %s38_s10 = int_to_ptr.vmem [resolvable:$true] %s37_s10 }
   0x3   :  { %p641_p1 = scmp.lt.u32.totalorder %s637_s13, %s901_s8 }
   0x5   :  { %p643_p2 = pnand %p641_p1, %p638_p0 }
   0x7   :  { %646 = shalt.err (!%p643_p2)
}
   0x8   :  { %s647_s18 = scalar_lea.vmem %s38_s10, 5120  ;;  %p652_p4 = scmp.lt.s32.totalorder %s38_s10, %s38_s10 }
   0x9   :  { %p648_p3 = scmp.ne.s32.totalorder %s38_s10, %s647_s18  ;;  %p653_p5 = scmp.lt.s32.totalorder %s647_s18, %s647_s18 }
   0xb   :  { %p654_p6 = por %p653_p5, %p652_p4 }
   0xd   :  { %p655_p7 = pnand %p654_p6, %p648_p3 }
   0xf   :  { %658 = shalt.err (!%p655_p7)
}
  0x10   :  { %s686_s19 = smov 128   ;;  %s687_s20 = smov 8  }
  0x11   :  { %43 = dma.hbm_to_vmem [thread:$0]  %s901_s8, 5120, %s38_s10, [#allocation3], %s686_s19, %s686_s19, %s687_s20  }
  0x12   :  { %681 = dma.done.wait [#allocation3], 5120  }
  0x13   :  { %682 = vsyncadd [#allocation3], 4294962176  ;;  %vm48_vm0 = vcmask 261120   ;;  %v47_v0 = vld [vmem:[%s893_s0] sm:$0xff]  ;;  %v115_v8 = vld [vmem:[%s897_s4 + $0x8] sm:$0xff]  ;;  %v688_v10 = vmov 0.0|0.0   ;;  %v96_v23 = vlaneseq }
  0x14   :  { %v49_v1 = vsel %vm48_vm0, %v47_v0, 0.0  ;;  %v114_v7 = vld [vmem:[%s897_s4] sm:$0xff]  ;;  %v116_v9 = vld [vmem:[%s897_s4 + $0x10] sm:$0xff]  ;;  %539 = vmatprep.subr.bf16.mxu0 %v688_v10  ;;  %v117_v12 = vld [vmem:[%s897_s4 + $0x18] sm:$0xff]  ;;  %s689_s18 = smov 96   ;;  %s690_s19 = smov 32  }
  0x15   :  { %50 = vadd.xlane.f32.xlu0 %v49_v1  ;;  %v540_v11 = vpack.c.bf16 %v115_v8, %v114_v7  ;;  %v543_v13 = vpack.c.bf16 %v117_v12, %v116_v9  ;;  %v118_v14 = vld [vmem:[%s897_s4 + $0x20] sm:$0xff]  ;;  %v119_v15 = vld [vmem:[%s897_s4 + $0x28] sm:$0xff]  ;;  %v120_v17 = vld [vmem:[%s897_s4 + $0x30] sm:$0xff]  ;;  %v797_v27 = vshrl.u32 %v96_v23, 7  ;;  %s691_s24 = smov 64   ;;  %vm90_vm1 = vcmask 523264  }
  0x16   :  { %v546_v16 = vpack.c.bf16 %v119_v15, %v118_v14  ;;  %v121_v18 = vld [vmem:[%s897_s4 + $0x38] sm:$0xff]  ;;  %v122_v24 = vld [vmem:[%s897_s4 + $0x40] sm:$0xff]  ;;  %v123_v25 = vld [vmem:[%s897_s4 + $0x48] sm:$0xff]  ;;  %vm92_vm2 = vcmask 785408   ;;  %vm692_vm3 = vmmov 0  }
  0x17   :  { %541 = vmatpush1.bf16.msra.mxu0 %v540_v11  ;;  %v549_v19 = vpack.c.bf16 %v121_v18, %v120_v17  ;;  %v552_v26 = vpack.c.bf16 %v123_v25, %v122_v24  ;;  %v124_v28 = vld [vmem:[%s897_s4 + $0x50] sm:$0xff]  ;;  %v125_v29 = vld [vmem:[%s897_s4 + $0x58] sm:$0xff]  ;;  %v102_v31 = vsub.s32 1, %v797_v27  ;;  %v126_v32 = vld [vmem:[%s897_s4 + $0x60] sm:$0xff]  ;;  %v98_v56 = vsub.s32 0, %v797_v27 }
  0x18   :  { %542 = vmatprep.subr.bf16.mxu0 %v688_v10  ;;  %v555_v30 = vpack.c.bf16 %v125_v29, %v124_v28  ;;  %v127_v33 = vld [vmem:[%s897_s4 + $0x68] sm:$0xff]  ;;  %v470_v35 = vld [vmem:[%s894_s1] ss:$0 sm:$0xff]  ;;  %v128_v40 = vld [vmem:[%s897_s4 + $0x70] sm:$0xff] }
  0x19   :  { %v94_v36 = vld [vmem:[%s896_s3] sm:$0x3]  ;;  %v558_v37 = vpack.c.bf16 %v127_v33, %v126_v32  ;;  %v129_v41 = vld [vmem:[%s897_s4 + $0x78] sm:$0xff]  ;;  %v131_v46 = vld [vmem:[%s897_s4 + $0x88] sm:$0xff] }
  0x1a   :  { %v471_v39 = vld [vmem:[%s895_s2] ss:$0 sm:$0xff]  ;;  %v103_v43 = vrot.slane %v94_v36, %v102_v31  ;;  %v561_v44 = vpack.c.bf16 %v129_v41, %v128_v40  ;;  %v132_v50 = vld [vmem:[%s897_s4 + $0x90] sm:$0xff]  ;;  %v133_v51 = vld [vmem:[%s897_s4 + $0x98] sm:$0xff]  ;;  %v99_v58 = vrot.slane %v94_v36, %v98_v56 }
  0x1b   :  { %544 = vmatpush1.bf16.msra.mxu0 %v543_v13  ;;  %v130_v45 = vld [vmem:[%s897_s4 + $0x80] sm:$0xff]  ;;  %v567_v52 = vpack.c.bf16 %v133_v51, %v132_v50  ;;  %v288_v14 = vld [vmem:[#allocation2 + $0x88] sm:$0xff]  ;;  %v289_v18 = vld [vmem:[#allocation2 + $0x90] sm:$0xff] }
  0x1c   :  { %545 = vmatprep.subr.bf16.mxu0 %v688_v10  ;;  %v564_v48 = vpack.c.bf16 %v131_v46, %v130_v45  ;;  %v287_v13 = vld [vmem:[#allocation2 + $0x80] sm:$0xff]  ;;  %v272_v17 = vld [vmem:[#allocation2 + $0x8] sm:$0xff]  ;;  %v274_v23 = vld [vmem:[#allocation2 + $0x18] sm:$0xff] }
  0x1d   :  { %v271_v15 = vld [vmem:[#allocation2] sm:$0xff]  ;;  %v292_v25 = vld [vmem:[#allocation2 + $0xa8] sm:$0xff]  ;;  %v293_v32 = vld [vmem:[#allocation2 + $0xb0] sm:$0xff] }
  0x1e   :  { %v291_v24 = vld [vmem:[#allocation2 + $0xa0] sm:$0xff]  ;;  %v294_v33 = vld [vmem:[#allocation2 + $0xb8] sm:$0xff]  ;;  %v277_v36 = vld [vmem:[#allocation2 + $0x30] sm:$0xff] }
  0x1f   :  { %547 = vmatpush1.bf16.msra.mxu0 %v546_v16  ;;  %v569_v16 = vpack.c.bf16 %v288_v14, %v287_v13  ;;  %v577_v28 = vpack.c.bf16 %v292_v25, %v291_v24  ;;  %v275_v29 = vld [vmem:[#allocation2 + $0x20] sm:$0xff]  ;;  %v280_v46 = vld [vmem:[#allocation2 + $0x48] sm:$0xff]  ;;  %v281_v50 = vld [vmem:[#allocation2 + $0x50] sm:$0xff] }
  0x20   :  { %548 = vmatprep.subr.bf16.mxu0 %v688_v10  ;;  %v279_v45 = vld [vmem:[#allocation2 + $0x40] sm:$0xff]  ;;  %v304_v24 = vld [vmem:[#allocation2 + $0x108] sm:$0xff] }
  0x21   :  { %570 = vmatprep.subr.bf16.mxu1 %v569_v16 }
  0x23   :  { %550 = vmatpush1.bf16.msra.mxu0 %v549_v19  ;;  %v290_v19 = vld [vmem:[#allocation2 + $0x98] sm:$0xff] }
  0x24   :  { %551 = vmatprep.subr.bf16.mxu0 %v688_v10 }
  0x27   :  { %553 = vmatpush1.bf16.msra.mxu0 %v552_v26 }
  0x28   :  { %554 = vmatprep.subr.bf16.mxu0 %v688_v10 }
  0x2b   :  { %556 = vmatpush1.bf16.msra.mxu0 %v555_v30  ;;  %v276_v30 = vld [vmem:[#allocation2 + $0x28] sm:$0xff] }
  0x2c   :  { %557 = vmatprep.subr.bf16.mxu0 %v688_v10 }
  0x2f   :  { %559 = vmatpush1.bf16.msra.mxu0 %v558_v37  ;;  %v278_v37 = vld [vmem:[#allocation2 + $0x38] sm:$0xff] }
  0x30   :  { %560 = vmatprep.subr.bf16.mxu0 %v688_v10 }
  0x33   :  { %562 = vmatpush1.bf16.msra.mxu0 %v561_v44 }
  0x34   :  { %563 = vmatprep.subr.bf16.mxu0 %v688_v10 }
  0x37   :  { %565 = vmatpush1.bf16.msra.mxu0 %v564_v48  ;;  %v297_v48 = vld [vmem:[#allocation2 + $0xd0] sm:$0xff] }
  0x38   :  { %566 = vmatprep.subr.bf16.mxu0 %v688_v10 }
  0x3b   :  { %568 = vmatpush1.bf16.msra.mxu0 %v567_v52  ;;  %v282_v52 = vld [vmem:[#allocation2 + $0x58] sm:$0xff] }
  0xa2   :  { %v51_v2 = vpop.xlane.xlu0 %50 }
  0xa3   :  { %v53_v3 = vmul.f32 0.03125, %v51_v2 }
  0xa5   :  { %v54_v4 = vsub.f32 %v47_v0, %v53_v3 }
  0xa7   :  { %v55_v5 = vmul.f32 %v54_v4, %v54_v4 }
  0xa9   :  { %v56_v6 = vsel %vm48_vm0, %v55_v5, 0.0 }
  0xaa   :  { %57 = vadd.xlane.f32.xlu0 %v56_v6 }
 0x137   :  { %v58_v20 = vpop.xlane.xlu0 %57 }
 0x138   :  { %v59_v21 = vmul.f32 0.03125, %v58_v20  ;;  %v571_v20 = vpack.c.bf16 %v272_v17, %v271_v15  ;;  %v254_v17 = vsub.s32 2, %v797_v27  ;;  %v693_v27 = vmov 0.0  }
 0x13a   :  { %v60_v22 = vadd.f32 1e-05, %v59_v21  ;;  %v573_v21 = vpack.c.bf16 %v290_v19, %v289_v18  ;;  %572 = vmatpush3.bf16.msra.mxu1 %v571_v20 }
 0x13c   :  { %623 = vrsqrt.f32 %v60_v22  ;;  %v273_v22 = vld [vmem:[#allocation2 + $0x10] sm:$0xff]  ;;  %574 = vmatprep.subr.bf16.mxu1 %v573_v21 }
 0x13d   :  { %v575_v26 = vpack.c.bf16 %v274_v23, %v273_v22  ;;  %v303_v23 = vld [vmem:[#allocation2 + $0x100] sm:$0xff] }
 0x13f   :  { %576 = vmatpush3.bf16.msra.mxu1 %v575_v26  ;;  %v602_v26 = vpack.c.bf16 %v304_v24, %v303_v23 }
 0x140   :  { %578 = vmatprep.subr.bf16.mxu1 %v577_v28  ;;  %v305_v28 = vld [vmem:[#allocation2 + $0x110] sm:$0xff] }
 0x146   :  { %v624_v34 = vpop.eup %623 }
 0x147   :  { %v62_v38 = vmul.f32 %v624_v34, %v54_v4  ;;  %v579_v34 = vpack.c.bf16 %v276_v30, %v275_v29  ;;  %v306_v29 = vld [vmem:[#allocation2 + $0x118] sm:$0xff] }
 0x148   :  { %v605_v30 = vpack.c.bf16 %v306_v29, %v305_v28 }
 0x149   :  { %v70_v42 = vmul.f32 %v470_v35, %v62_v38  ;;  %v581_v35 = vpack.c.bf16 %v294_v33, %v293_v32  ;;  %580 = vmatpush3.bf16.msra.mxu1 %v579_v34  ;;  %v583_v38 = vpack.c.bf16 %v278_v37, %v277_v36  ;;  %v307_v32 = vld [vmem:[#allocation2 + $0x120] sm:$0xff]  ;;  %v308_v33 = vld [vmem:[#allocation2 + $0x128] sm:$0xff]  ;;  %v310_v36 = vld [vmem:[#allocation2 + $0x138] sm:$0xff] }
 0x14a   :  { %v608_v34 = vpack.c.bf16 %v308_v33, %v307_v32 }
 0x14b   :  { %v78_v47 = vadd.f32 %v471_v39, %v70_v42  ;;  %582 = vmatprep.subr.bf16.mxu1 %v581_v35  ;;  %v295_v42 = vld [vmem:[#allocation2 + $0xc0] sm:$0xff]  ;;  %v309_v35 = vld [vmem:[#allocation2 + $0x130] sm:$0xff] }
 0x14d   :  { %86 = vrot.lane.b32.xlu0 %v78_v47, %s689_s18  ;;  %80 = vrot.lane.b32.xlu1 %v78_v47, %s690_s19  ;;  %v107_v49 = vsub.f32 %v78_v47, %v103_v43  ;;  %v296_v43 = vld [vmem:[#allocation2 + $0xc8] sm:$0xff] }
 0x14e   :  { %584 = vmatpush3.bf16.msra.mxu1 %v583_v38  ;;  %v585_v44 = vpack.c.bf16 %v296_v43, %v295_v42  ;;  %v611_v38 = vpack.c.bf16 %v310_v36, %v309_v35 }
 0x14f   :  { %625 = vtanh.f32 %v107_v49  ;;  %v298_v49 = vld [vmem:[#allocation2 + $0xd8] sm:$0xff] }
 0x150   :  { %586 = vmatprep.subr.bf16.mxu1 %v585_v44  ;;  %v589_v51 = vpack.c.bf16 %v298_v49, %v297_v48 }
 0x151   :  { %83 = vrot.lane.b32.xlu1 %v78_v47, %s691_s24 }
 0x159   :  { %v626_v53 = vpop.eup %625 }
 0x15a   :  { %v111_v54 = vmul.f32 %v626_v53, %v626_v53  ;;  %v299_v53 = vld [vmem:[#allocation2 + $0xe0] sm:$0xff] }
 0x15c   :  { %v113_v55 = vsub.f32 1.0, %v111_v54  ;;  %v300_v54 = vld [vmem:[#allocation2 + $0xe8] sm:$0xff] }
 0x15e   :  { %472 = vmatprep.mubr.msk.f32.mxu0 %vm48_vm0, %v113_v55  ;;  %v591_v55 = vpack.c.bf16 %v282_v52, %v281_v50 }
 0x1bf   :  { %v81_v57 = vpop.permute.xlu1 %80  ;;  %v87_v61 = vpop.permute.xlu0 %86 }
 0x1c0   :  { %v89_v59 = vsel %vm48_vm0, %v78_v47, %v81_v57  ;;  %v587_v47 = vpack.c.bf16 %v280_v46, %v279_v45  ;;  %v593_v57 = vpack.c.bf16 %v300_v54, %v299_v53 }
 0x1c2   :  { %588 = vmatpush3.bf16.msra.mxu1 %v587_v47 }
 0x1c3   :  { %v84_v60 = vpop.permute.xlu1 %83  ;;  %590 = vmatprep.subr.bf16.mxu1 %v589_v51 }
 0x1c4   :  { %v91_v62 = vsel %vm90_vm1, %v89_v59, %v84_v60  ;;  %v284_v59 = vld [vmem:[#allocation2 + $0x68] sm:$0xff]  ;;  %v301_v60 = vld [vmem:[#allocation2 + $0xf0] sm:$0xff] }
 0x1c5   :  { %v93_v63 = vsel %vm92_vm2, %v91_v62, %v87_v61  ;;  %v473_v62 = vld [vmem:[%s898_s5] ss:$0 sm:$0xff] }
 0x1c6   :  { %v106_v0 = vsub.f32 %v93_v63, %v99_v58  ;;  %v283_v58 = vld [vmem:[#allocation2 + $0x60] sm:$0xff]  ;;  %v302_v63 = vld [vmem:[#allocation2 + $0xf8] sm:$0xff]  ;;  %592 = vmatpush3.bf16.msra.mxu1 %v591_v55 }
 0x1c7   :  { %594 = vmatprep.subr.bf16.mxu1 %v593_v57 }
 0x1c8   :  { %627 = vtanh.f32 %v106_v0 }
 0x1d2   :  { %v628_v1 = vpop.eup %627 }
 0x1d3   :  { %v110_v2 = vmul.f32 %v628_v1, %v628_v1  ;;  %v595_v1 = vpack.c.bf16 %v284_v59, %v283_v58 }
 0x1d5   :  { %v112_v3 = vsub.f32 1.0, %v110_v2  ;;  %v474_v2 = vld [vmem:[%s899_s6] ss:$0 sm:$0xff]  ;;  %596 = vmatpush3.bf16.msra.mxu1 %v595_v1  ;;  %s694_s6 = smov [#allocation5]  }
 0x1d7   :  { %202 = vmatmul.mubr.f32.vlgmr.msra.gmra.mrb[0].mxu0 %v112_v3  ;;  %v597_v3 = vpack.c.bf16 %v302_v63, %v301_v60 }
 0x1d9   :  { %598 = vmatprep.subr.bf16.mxu1 %v597_v3 }
 0x2aa   :  { %v203_v4 = vpop.f32.mrb[0].mxu0 }
 0x2ab   :  { %v205_v5 = vpop.f32.mrb[1].mxu0  ;;  %v207_v6 = vsel %vm90_vm1, %v203_v4, 0.0 }
 0x2ac   :  { %208 = vadd.xlane.f32.xlu1 %v207_v6  ;;  %v286_v5 = vld [vmem:[#allocation2 + $0x78] sm:$0xff] }
 0x339   :  { %v209_v7 = vpop.xlane.xlu1 %208 }
 0x33a   :  { %v211_v8 = vmul.f32 0.015625, %v209_v7 }
 0x33c   :  { %v854_v9 = vsub.f32 %v203_v4, %v211_v8  ;;  %v285_v4 = vld [vmem:[#allocation2 + $0x70] sm:$0xff] }
 0x33d   :  { %v599_v8 = vpack.c.bf16 %v286_v5, %v285_v4 }
 0x33e   :  { %v213_v11 = vmul.f32 %v854_v9, %v854_v9 }
 0x33f   :  { %600 = vmatpush3.bf16.msra.mxu1 %v599_v8 }
 0x340   :  { %v214_v12 = vsel %vm90_vm1, %v213_v11, 0.0  ;;  %601 = vmatprep.subr.bf16.mxu1 %v688_v10 }
 0x341   :  { %215 = vadd.xlane.f32.xlu0 %v214_v12 }
 0x3ce   :  { %v216_v39 = vpop.xlane.xlu0 %215 }
 0x3cf   :  { %v217_v40 = vmul.f32 0.015625, %v216_v39 }
 0x3d1   :  { %v218_v41 = vadd.f32 1e-05, %v217_v40 }
 0x3d3   :  { %629 = vrsqrt.f32 %v218_v41 }
 0x3dd   :  { %v630_v61 = vpop.eup %629 }
 0x3de   :  { %v220_v0 = vmul.f32 %v630_v61, %v854_v9  ;;  %v242_v9 = vld [vmem:[%s900_s7] sm:$0x7]  ;;  %s461_s7 = sshll.u32 %s694_s6, 4  ;;  %s462_s7 = int_to_ptr.vmem [resolvable:$true] %s461_s7 }
 0x3df   :  { %v247_v11 = vrot.slane %v242_v9, %v98_v56  ;;  %v251_v12 = vrot.slane %v242_v9, %v102_v31  ;;  %v255_v18 = vrot.slane %v242_v9, %v254_v17  ;;  %s659_s28 = scalar_lea.vmem %s462_s7, 128  ;;  %p664_p9 = scmp.lt.s32.totalorder %s462_s7, %s462_s7 }
 0x3e0   :  { %v228_v6 = vmul.f32 %v473_v62, %v220_v0  ;;  %p660_p8 = scmp.ne.s32.totalorder %s462_s7, %s659_s28  ;;  %p665_p10 = scmp.lt.s32.totalorder %s659_s28, %s659_s28 }
 0x3e2   :  { %v236_v7 = vadd.f32 %v474_v2, %v228_v6  ;;  %p666_p11 = por %p665_p10, %p664_p9 }
 0x3e4   :  { %238 = vrot.lane.b32.xlu1 %v236_v7, %s691_s24  ;;  %v261_v20 = vsub.f32 %v236_v7, %v255_v18  ;;  %p667_p12 = pnand %p666_p11, %p660_p8 }
 0x456   :  { %v239_v13 = vpop.permute.xlu1 %238 }
 0x457   :  { %v241_v14 = vsel %vm90_vm1, %v236_v7, %v239_v13 }
 0x458   :  { %v259_v15 = vsub.f32 %v241_v14, %v247_v11  ;;  %v260_v16 = vsub.f32 %v241_v14, %v251_v12 }
 0x45a   :  { %631 = vtanh.f32 %v259_v15 }
 0x45b   :  { %633 = vtanh.f32 %v260_v16 }
 0x45c   :  { %635 = vtanh.f32 %v261_v20 }
 0x464   :  { %v632_v19 = vpop.eup %631 }
 0x465   :  { %v634_v21 = vpop.eup %633  ;;  %v265_v22 = vmul.f32 %v632_v19, %v632_v19 }
 0x466   :  { %v266_v56 = vmul.f32 %v634_v21, %v634_v21  ;;  %v636_v37 = vpop.eup %635 }
 0x467   :  { %v268_v25 = vsub.f32 1.0, %v265_v22  ;;  %v267_v39 = vmul.f32 %v636_v37, %v636_v37 }
 0x468   :  { %v269_v31 = vsub.f32 1.0, %v266_v56 }
 0x469   :  { %v270_v40 = vsub.f32 1.0, %v267_v39 }
 0x46a   :  { %378 = vmatprep.mubr.f32.mxu1 %v269_v31 }
 0x46b   :  { %379 = vmatmul.mubr.f32.vlgmr.msra.gmra.mrb[0].mxu1 %v268_v25 }
 0x46c   :  { %603 = vmatpush3.bf16.msra.mxu1 %v602_v26  ;;  %536 = vmatprep.mubr.msk.f32.mxu1 %vm692_vm3, %v693_v27 }
 0x46d   :  { %604 = vmatprep.subr.bf16.mxu1 %v688_v10 }
 0x470   :  { %606 = vmatpush3.bf16.msra.mxu1 %v605_v30 }
 0x471   :  { %607 = vmatprep.subr.bf16.mxu1 %v688_v10 }
 0x474   :  { %609 = vmatpush3.bf16.msra.mxu1 %v608_v34 }
 0x475   :  { %610 = vmatprep.subr.bf16.mxu1 %v688_v10 }
 0x478   :  { %612 = vmatpush3.bf16.msra.mxu1 %v611_v38 }
 0x47b   :  { %537 = vmatmul.mubr.msk.f32.vlgmr.msra.gmra.mrb[2].mxu1 %vm90_vm1, %v270_v40 }
 0x53e   :  { %v508_v41 = vpop.f32.mrb[0].mxu1 }
 0x53f   :  { %v509_v42 = vpop.f32.mrb[1].mxu1 }
 0x540   :  { %v510_v43 = vadd.f32 %v509_v42, %v508_v41 }
 0x54e   :  { %v450_v44 = vpop.f32.mrb[2].mxu1 }
 0x54f   :  { %v451_v45 = vadd.f32 %v510_v43, %v450_v44  ;;  %v538_v46 = vpop.f32.mrb[3].mxu1 }
 0x551   :  { %454 = vst [vmem:[#allocation5] sm:$0xff] %v451_v45 }
 0x552   :  { %670 = shalt.err (!%p667_p12)
}
 0x553   :  { %s671_s30 = scalar_lea.hbm %s902_s9, 128 }
 0x554   :  { %p672_p13 = scmp.ne.s32.totalorder %s902_s9, %s671_s30  ;;  %p675_p0 = scmp.lt.u32.totalorder %s671_s30, %s902_s9 }
 0x556   :  { %p677_p1 = pnand %p675_p0, %p672_p13 }
 0x558   :  { %680 = shalt.err (!%p677_p1)
}
 0x559   :  { %464 = dma.vmem_to_hbm [thread:$0]  %s462_s7, 128, %s902_s9, [#allocation4]  }
 0x55a   :  { %683 = dma.done.wait [#allocation4], 128  }
 0x55b   :  { %684 = vsyncadd [#allocation4], 4294967168 }
 0x55c   :  { %468 = vsyncpa [#allocation3], 1 }
 0x55d   :  { %469 = vsyncpa [#allocation4], 1 }

</bundles_post_ra>
